<compile_context>
chip_gen: v5e
topology: v5e:2x2
jax: 0.10.0
libtpu: 0.0.40
codegen_flags: <defaults>
</compile_context>

<pallas_src>
import functools

import jax
import jax.numpy as jnp
from jax.experimental import pallas as pl
from jax.experimental.pallas import tpu as pltpu

_LANE = 128
_SUBLANE = 8


def _cdiv(a, b):
    return -(-a // b)


def _mape_sum_kernel(p_ref, t_ref, out_ref, *, rows, tile_rows,
                     tiles_per_partial, needs_mask):
    """Accumulate sum(|(t - p) / t|) of this tile into an (8, 128) slab.

    The output block index depends only on grid axis 0, so the block stays
    resident in VMEM across the (arbitrary) reduction axis 1 and acts as the
    per-partial accumulator.
    """
    j = pl.program_id(1)

    @pl.when(j == 0)
    def _():
        out_ref[...] = jnp.zeros_like(out_ref)

    t = t_ref[...].astype(jnp.float32)
    p = p_ref[...].astype(jnp.float32)

    if needs_mask:
        # Last (partial) tile and any phantom tile from the ceil/floor
        # 2-way split: mask invalid rows with a safe denominator so no
        # NaN/Inf from unspecified padding rows leaks into the accumulator.
        c = pl.program_id(0)
        global_tile = c * tiles_per_partial + j
        start_row = global_tile * tile_rows
        valid_rows = jnp.clip(rows - start_row, 0, tile_rows)
        row_ids = jax.lax.broadcasted_iota(jnp.int32, (tile_rows, 1), 0)
        mask = row_ids < valid_rows
        t_safe = jnp.where(mask, t, jnp.float32(1.0))
        val = jnp.abs((t - p) / t_safe)
        val = jnp.where(mask, val, jnp.float32(0.0))
    else:
        val = jnp.abs((t - p) / t)

    # Lane/sublane-parallel accumulation: (tile_rows//8 - 1) elementwise vreg
    # adds on the VPU per tile; the expensive cross-lane reduce happens once,
    # outside the kernel.
    out_ref[...] += val.reshape(
        tile_rows // _SUBLANE, _SUBLANE, _LANE).sum(axis=0)


def mape_loss(predictions, targets, *, tile_rows=4096):
    """Mean absolute percentage error, computed in a Pallas TPU kernel."""
    assert predictions.shape == targets.shape
    n = predictions.size

    p_flat = jnp.ravel(predictions)
    t_flat = jnp.ravel(targets)

    rows = n // _LANE
    rem = n - rows * _LANE

    if rows < _SUBLANE:
        # Degenerate tiny input (< one (8,128) vreg): just reduce in JAX.
        pf = p_flat.astype(jnp.float32)
        tf = t_flat.astype(jnp.float32)
        return jnp.mean(jnp.abs((tf - pf) / tf))

    main = rows * _LANE
    if rem == 0:
        # Zero-copy 2D view: no slice, no pad, no astype on the host side.
        p2d = p_flat.reshape(rows, _LANE)
        t2d = t_flat.reshape(rows, _LANE)
    else:
        # TODO(synk): when n is not a multiple of 128 this prefix slice still
        # materializes an HBM copy of ~n elements per input; covering the
        # ragged sub-row fully in-kernel would need 1-D blocks / manual DMA.
        p2d = p_flat[:main].reshape(rows, _LANE)
        t2d = t_flat[:main].reshape(rows, _LANE)

    # Effective tile: multiple of 8 rows, no bigger than the data.
    tile_rows = max(_SUBLANE, (tile_rows // _SUBLANE) * _SUBLANE)
    tile_rows_eff = min(tile_rows, (rows // _SUBLANE) * _SUBLANE)
    n_row_tiles = _cdiv(rows, tile_rows_eff)

    # Guaranteed 2-way split whenever there are >= 2 tiles so a v7x megacore
    # shards the reduction across both TensorCores; any phantom tile from the
    # ceil split is masked to zero in the kernel. Harmless on 1-TC chips.
    num_partials = 2 if n_row_tiles >= 2 else 1
    tiles_per_partial = _cdiv(n_row_tiles, num_partials)

    needs_mask = (rows % tile_rows_eff != 0) or (
        num_partials * tiles_per_partial != n_row_tiles)

    last_tile = n_row_tiles - 1

    def in_map(c, j):
        g = c * tiles_per_partial + j
        # Clamp phantom tiles onto the last real block (its contents are
        # fully masked in the kernel).
        return (jnp.minimum(g, last_tile), 0)

    kernel = functools.partial(
        _mape_sum_kernel,
        rows=rows,
        tile_rows=tile_rows_eff,
        tiles_per_partial=tiles_per_partial,
        needs_mask=needs_mask,
    )

    # 2 inputs x 2 pipeline buffers per block, plus generous headroom; fits
    # comfortably inside v5e/v6e (128 MiB) and v7x (64 MiB) physical VMEM at
    # the default 4096-row tile (~8 MiB of buffers).
    block_bytes = tile_rows_eff * _LANE * p2d.dtype.itemsize
    vmem_limit = int(max(32 * 1024 * 1024, 4 * block_bytes + 8 * 1024 * 1024))

    partials = pl.pallas_call(
        kernel,
        out_shape=jax.ShapeDtypeStruct(
            (num_partials * _SUBLANE, _LANE), jnp.float32),
        grid_spec=pltpu.PrefetchScalarGridSpec(
            num_scalar_prefetch=0,
            grid=(num_partials, tiles_per_partial),
            in_specs=[
                pl.BlockSpec((tile_rows_eff, _LANE), in_map),
                pl.BlockSpec((tile_rows_eff, _LANE), in_map),
            ],
            out_specs=pl.BlockSpec((_SUBLANE, _LANE), lambda c, j: (c, 0)),
        ),
        compiler_params=pltpu.CompilerParams(
            dimension_semantics=("parallel", "arbitrary"),
            vmem_limit_bytes=vmem_limit,
        ),
    )(p2d, t2d)

    total = jnp.sum(partials)

    # Sub-128-element remainder (only when n % 128 != 0): < one vreg of data,
    # folded in with a tiny jnp reduction.
    if rem != 0:
        p_tail = p_flat[main:].astype(jnp.float32)
        t_tail = t_flat[main:].astype(jnp.float32)
        total = total + jnp.sum(jnp.abs((t_tail - p_tail) / t_tail))

    return total / jnp.float32(n)


if __name__ == "__main__":
    key = jax.random.PRNGKey(0)
    kp, kt = jax.random.split(key)
    # NCHW-shaped tensor; the loss flattens everything.
    shape = (2, 4, 16, 16)
    predictions = jax.random.normal(kp, shape, dtype=jnp.float32)
    # Keep targets away from zero so the division is well-conditioned.
    targets = jax.random.normal(kt, shape, dtype=jnp.float32) + 3.0

    loss = mape_loss(predictions, targets)
    jax.block_until_ready(loss)

    # Pure-JAX reference check.
    ref = jnp.mean(jnp.abs((targets - predictions) / targets))
    assert jnp.allclose(loss, ref, rtol=1e-5, atol=1e-6), (loss, ref)

    print("KERNEL_OK")
</pallas_src>

<mosaic_0001>
module attributes {stable_mosaic.version = 11 : i64} {
  func.func @_mape_sum_kernel(%arg0: i32, %arg1: i32, %arg2: memref<16x128xf32, #tpu.memory_space<vmem>>, %arg3: memref<16x128xf32, #tpu.memory_space<vmem>>, %arg4: memref<8x128xf32, #tpu.memory_space<vmem>>) attributes {dimension_semantics = [#tpu.dimension_semantics<parallel>, #tpu.dimension_semantics<arbitrary>], iteration_bounds = array<i64: 1, 1>, scalar_prefetch = 0 : i64, scratch_operands = 0 : i64, tpu.core_type = #tpu.core_type<tc>, window_params = [{transform_indices = @transform_0, window_bounds = array<i64: 16, 128>}, {transform_indices = @transform_1, window_bounds = array<i64: 16, 128>}, {transform_indices = @transform_2, window_bounds = array<i64: 8, 128>}]} {
    %c0_i32 = arith.constant 0 : i32
    %0 = arith.cmpi eq, %arg1, %c0_i32 : i32
    %1 = arith.extui %0 : i1 to i32
    %c0_i32_0 = arith.constant 0 : i32
    %2 = arith.cmpi ne, %1, %c0_i32_0 : i32
    scf.if %2 {
      %cst_8 = arith.constant 0.000000e+00 : f32
      %13 = vector.broadcast %cst_8 : f32 to vector<8x128xf32>
      %c0_9 = arith.constant 0 : index
      %c0_10 = arith.constant 0 : index
      %14 = vector.load %arg4[%c0_9, %c0_10] : memref<8x128xf32, #tpu.memory_space<vmem>>, vector<8x128xf32>
      tpu.vector_store %arg4[%c0_9, %c0_10], %13 {strides = array<i32>} : memref<8x128xf32, #tpu.memory_space<vmem>>, vector<8x128xf32>,
    } else {
    }
    %c0 = arith.constant 0 : index
    %c0_1 = arith.constant 0 : index
    %3 = vector.load %arg3[%c0, %c0_1] : memref<16x128xf32, #tpu.memory_space<vmem>>, vector<16x128xf32>
    %c0_2 = arith.constant 0 : index
    %c0_3 = arith.constant 0 : index
    %4 = vector.load %arg2[%c0_2, %c0_3] : memref<16x128xf32, #tpu.memory_space<vmem>>, vector<16x128xf32>
    %5 = arith.subf %3, %4 : vector<16x128xf32>
    %6 = arith.divf %5, %3 : vector<16x128xf32>
    %7 = math.absf %6 : vector<16x128xf32>
    %c0_4 = arith.constant 0 : index
    %c0_5 = arith.constant 0 : index
    %8 = vector.load %arg4[%c0_4, %c0_5] : memref<8x128xf32, #tpu.memory_space<vmem>>, vector<8x128xf32>
    %9 = vector.shape_cast %7 : vector<16x128xf32> to vector<2x8x128xf32>
    %cst = arith.constant dense<0.000000e+00> : vector<8x128xf32>
    %10 = vector.multi_reduction <add>, %9, %cst [0] : vector<2x8x128xf32> to vector<8x128xf32>
    %11 = arith.addf %8, %10 : vector<8x128xf32>
    %c0_6 = arith.constant 0 : index
    %c0_7 = arith.constant 0 : index
    %12 = vector.load %arg4[%c0_6, %c0_7] : memref<8x128xf32, #tpu.memory_space<vmem>>, vector<8x128xf32>
    tpu.vector_store %arg4[%c0_6, %c0_7], %11 {strides = array<i32>} : memref<8x128xf32, #tpu.memory_space<vmem>>, vector<8x128xf32>,
    return
  }
  func.func @transform_0(%arg0: i32, %arg1: i32) -> (i32, i32) {
    %c1_i32 = arith.constant 1 : i32
    %0 = arith.muli %arg0, %c1_i32 : i32
    %1 = arith.addi %0, %arg1 : i32
    %c0_i32 = arith.constant 0 : i32
    %2 = arith.minsi %1, %c0_i32 : i32
    %c0_i32_0 = arith.constant 0 : i32
    %c0_i32_1 = arith.constant 0 : i32
    return %2, %c0_i32_0 : i32, i32
  }
  func.func @transform_1(%arg0: i32, %arg1: i32) -> (i32, i32) {
    %c1_i32 = arith.constant 1 : i32
    %0 = arith.muli %arg0, %c1_i32 : i32
    %1 = arith.addi %0, %arg1 : i32
    %c0_i32 = arith.constant 0 : i32
    %2 = arith.minsi %1, %c0_i32 : i32
    %c0_i32_0 = arith.constant 0 : i32
    %c0_i32_1 = arith.constant 0 : i32
    return %2, %c0_i32_0 : i32, i32
  }
  func.func @transform_2(%arg0: i32, %arg1: i32) -> (i32, i32) {
    %c0_i32 = arith.constant 0 : i32
    %c0_i32_0 = arith.constant 0 : i32
    return %arg0, %c0_i32 : i32, i32
  }
}

</mosaic_0001>

<bundles_post_ra>
// kernel: tpu_custom_call.1
= control target key start
LH: loop header
LB: loop body
LE: loop exit
PB: predicated region body
PF: predicated region fallthrough
CT: control target
= control target key end

     0   :  { %7 = vsyncpa [#allocation3], 0  ;;  %s250_s0 = inlined_call_operand.hbm [shape: f32[16,128], index: 0, kind: input, shape index: {}]   ;;  %s251_s1 = inlined_call_operand.hbm [shape: f32[16,128], index: 1, kind: input, shape index: {}]   ;;  %s252_s2 = inlined_call_operand.hbm [shape: f32[8,128], index: 2, kind: output, shape index: {}]  }
   0x1   :  { %8 = vsyncpa [#allocation6], 0 }
   0x2   :  { %9 = vsyncpa [#allocation4], 0  ;;  %s20_s11 = sshll.u32 %s250_s0, 4  ;;  %s221_s12 = smov [#allocation2]   ;;  %s21_s11 = int_to_ptr.hbm [resolvable:$true] %s20_s11 }
   0x3   :  { %s22_s13 = sshll.u32 %s221_s12, 4  ;;  %s39_s16 = sshll.u32 %s251_s1, 4  ;;  %s23_s13 = int_to_ptr.vmem [resolvable:$true] %s22_s13  ;;  %s40_s16 = int_to_ptr.hbm [resolvable:$true] %s39_s16 }
   0x4   :  { %s222_s17 = smov 128   ;;  %s223_s18 = smov 8  }
   0x5   :  { %28 = dma.hbm_to_vmem [thread:$0]  %s21_s11, 256, %s23_s13, [#allocation3], %s222_s17, %s222_s17, %s223_s18  }
   0x6   :  { %s224_s19 = smov [#allocation5]  }
   0x7   :  { %s41_s20 = sshll.u32 %s224_s19, 4  ;;  %s42_s20 = int_to_ptr.vmem [resolvable:$true] %s41_s20 }
   0x8   :  { %47 = dma.hbm_to_vmem [thread:$0]  %s40_s16, 256, %s42_s20, [#allocation6], %s222_s17, %s222_s17, %s223_s18  }
   0x9   :  { %215 = dma.done.wait [#allocation3], 256  }
   0xa   :  { %216 = vsyncadd [#allocation3], 4294967040 }
   0xb   :  { %217 = dma.done.wait [#allocation6], 256  }
   0xc   :  { %218 = vsyncadd [#allocation6], 4294967040  ;;  %v69_v0 = vld [vmem:[#allocation5] sm:$0xff]  ;;  %v70_v1 = vld [vmem:[#allocation5 + $0x8] sm:$0xff]  ;;  %s225_s0 = smov [#allocation7]   ;;  %s118_s23 = sshll.u32 %s252_s2, 4  ;;  %s119_s23 = int_to_ptr.hbm [resolvable:$true] %s118_s23 }
   0xd   :  { %139 = vrcp.f32 %v69_v0  ;;  %vm80_vm0 = vweird.f32 %v69_v0  ;;  %v86_v5 = vand.u32 2147483648, %v69_v0  ;;  %v84_v8 = vand.u32 2147483647, %v69_v0  ;;  %v71_v10 = vld [vmem:[#allocation2] sm:$0xff]  ;;  %v72_v13 = vld [vmem:[#allocation2 + $0x8] sm:$0xff]  ;;  %s116_s1 = sshll.u32 %s225_s0, 4  ;;  %s117_s1 = int_to_ptr.vmem [resolvable:$true] %s116_s1 }
   0xe   :  { %141 = vrcp.f32 %v70_v1  ;;  %v101_v9 = vand.u32 2147483648, %v70_v1  ;;  %vm95_vm2 = vweird.f32 %v70_v1  ;;  %v99_v12 = vand.u32 2147483647, %v70_v1 }
   0xf   :  { %v87_v15 = vor.u32 1.1754944e-38, %v86_v5  ;;  %v73_v17 = vsub.f32 %v69_v0, %v71_v10  ;;  %vm85_vm5 = vcmp.eq.f32.partialorder %v84_v8, 8.507059e+37  ;;  %v74_v20 = vsub.f32 %v70_v1, %v72_v13 }
  0x10   :  { %v102_v19 = vor.u32 1.1754944e-38, %v101_v9  ;;  %vm100_vm7 = vcmp.eq.f32.partialorder %v99_v12, 8.507059e+37 }
  0x13   :  { %v140_v2 = vpop.eup %139 }
  0x14   :  { %v142_v3 = vpop.eup %141  ;;  %v76_v4 = vmul.f32 %v140_v2, %v69_v0  ;;  %vm81_vm1 = vweird.f32 %v140_v2 }
  0x15   :  { %v91_v6 = vmul.f32 %v142_v3, %v70_v1  ;;  %vm96_vm3 = vweird.f32 %v142_v3  ;;  %vm82_vm4 = vmor %vm80_vm0, %vm81_vm1 }
  0x16   :  { %v77_v7 = vsub.f32 1.0, %v76_v4  ;;  %vm97_vm6 = vmor %vm95_vm2, %vm96_vm3 }
  0x17   :  { %v92_v11 = vsub.f32 1.0, %v91_v6 }
  0x18   :  { %v78_v14 = vmul.f32 %v140_v2, %v77_v7 }
  0x19   :  { %v93_v16 = vmul.f32 %v142_v3, %v92_v11 }
  0x1a   :  { %v79_v18 = vadd.f32 %v140_v2, %v78_v14 }
  0x1b   :  { %v94_v21 = vadd.f32 %v142_v3, %v93_v16 }
  0x1c   :  { %v83_v22 = vsel %vm82_vm4, %v140_v2, %v79_v18 }
  0x1d   :  { %v88_v23 = vsel %vm85_vm5, %v87_v15, %v83_v22  ;;  %v98_v24 = vsel %vm97_vm6, %v142_v3, %v94_v21 }
  0x1e   :  { %v89_v25 = vmul.f32 %v88_v23, %v73_v17  ;;  %v103_v26 = vsel %vm100_vm7, %v102_v19, %v98_v24 }
  0x1f   :  { %v104_v27 = vmul.f32 %v103_v26, %v74_v20 }
  0x20   :  { %v105_v28 = vand.u32 2147483647, %v89_v25 }
  0x21   :  { %v106_v29 = vand.u32 2147483647, %v104_v27 }
  0x23   :  { %v108_v30 = vadd.f32 %v106_v29, %v105_v28 }
  0x25   :  { %110 = vst [vmem:[#allocation7] sm:$0xff] %v108_v30 }
  0x26   :  { %121 = dma.vmem_to_hbm [thread:$0]  %s117_s1, 128, %s119_s23, [#allocation4]  }
  0x27   :  { %219 = dma.done.wait [#allocation4], 128  }
  0x28   :  { %220 = vsyncadd [#allocation4], 4294967168 }
  0x29   :  { %126 = vsyncpa [#allocation3], 1 }
  0x2a   :  { %127 = vsyncpa [#allocation6], 1 }
  0x2b   :  { %128 = vsyncpa [#allocation4], 1 }

</bundles_post_ra>
